<compile_context>
chip_gen: v7x
topology: tpu7x:2x2x1
jax: 0.10.0
libtpu: 0.0.40
codegen_flags: <defaults>
</compile_context>

<pallas_src>
import jax
import jax.numpy as jnp
from jax.experimental import pallas as pl
from jax.experimental.pallas import tpu as pltpu


def relu_conv1x1_kernel(x_ref, w_ref, o_ref):
    # x_ref: (1, C_in, HW) bf16   w_ref: (block_co, C_in) bf16
    # o_ref: (1, block_co, HW) f32
    x = jnp.maximum(x_ref[0], 0)  # ReLU on the VPU (bf16, sign-preserving)
    # 1x1 conv == matmul on the MXU: (block_co, C_in) @ (C_in, HW) -> (block_co, HW)
    # bf16 inputs, f32 accumulation.
    o_ref[0] = jnp.dot(
        w_ref[...], x, preferred_element_type=jnp.float32
    ).astype(o_ref.dtype)


def _pick_block_co(c_out: int) -> int:
    # 2-way split when it stays sublane-aligned (feeds both v7x TCs); else whole.
    if c_out % 1024 == 0:
        return 512
    if c_out % 16 == 0:
        return c_out // 2
    return c_out


def relu_conv1x1(x_nchw: jax.Array, weight_oc_ic: jax.Array) -> jax.Array:
    """relu(x) followed by 1x1 conv (no bias), matching torch Conv2d(256,1024,1,1).

    x_nchw:       (N, C_in, H, W)  float32
    weight_oc_ic: (C_out, C_in)    float32 (torch weight squeezed from (C_out, C_in, 1, 1))
    returns:      (N, C_out, H, W) float32
    """
    N, C_in, H, W = x_nchw.shape
    C_out = weight_oc_ic.shape[0]
    HW = H * W

    # Pure reshape only (no HBM transpose); cast to bf16 to halve HBM traffic
    # and hit the native bf16 MXU path.  Accumulation stays f32 in-kernel.
    x_flat = x_nchw.reshape(N, C_in, HW).astype(jnp.bfloat16)
    w_bf16 = weight_oc_ic.astype(jnp.bfloat16)

    block_co = _pick_block_co(C_out)
    n_co_blocks = C_out // block_co

    out_dtype = jnp.float32
    cost = pl.CostEstimate(
        flops=2 * N * HW * C_in * C_out,
        transcendentals=0,
        bytes_accessed=(
            x_flat.size * x_flat.dtype.itemsize
            + w_bf16.size * w_bf16.dtype.itemsize
            + N * C_out * HW * jnp.dtype(out_dtype).itemsize
        ),
    )

    out_flat = pl.pallas_call(
        relu_conv1x1_kernel,
        out_shape=jax.ShapeDtypeStruct((N, C_out, HW), out_dtype),
        grid_spec=pltpu.PrefetchScalarGridSpec(
            num_scalar_prefetch=0,
            # C_out blocks outer, batch inner: weight block stays resident
            # across the batch loop; only the small x slab re-streams.
            grid=(n_co_blocks, N),
            in_specs=[
                # Full (C_in, HW) slab per batch image.  HW is the full last
                # dim, so the (8,128) rule is satisfied even though HW=196.
                pl.BlockSpec((1, C_in, HW), lambda j, n: (n, 0, 0)),
                # Weight block: (block_co, C_in); constant across inner n.
                pl.BlockSpec((block_co, C_in), lambda j, n: (j, 0)),
            ],
            out_specs=pl.BlockSpec((1, block_co, HW), lambda j, n: (n, j, 0)),
        ),
        compiler_params=pltpu.CompilerParams(
            dimension_semantics=("parallel", "parallel"),
        ),
        cost_estimate=cost,
    )(x_flat, w_bf16)

    # Pure reshape back to NCHW -- no transpose.
    return out_flat.reshape(N, C_out, H, W)


if __name__ == "__main__":
    key = jax.random.PRNGKey(0)
    kx, kw = jax.random.split(key)

    # Shapes from the module: x105 ~ (1, 256, 14, 14); conv 256 -> 1024, 1x1, no bias.
    x = jax.random.normal(kx, (1, 256, 14, 14), dtype=jnp.float32)
    # Deterministic synthetic weight (torch shape (1024, 256, 1, 1) squeezed).
    weight = jax.random.normal(kw, (1024, 256), dtype=jnp.float32) * 0.05

    out = relu_conv1x1(x, weight)
    out = jax.block_until_ready(out)
    assert out.shape == (1, 1024, 14, 14), out.shape

    # Reference computed with the same bf16-input / f32-accumulate recipe so the
    # tolerance reflects only accumulation-order differences.
    x_ref = jnp.maximum(x, 0.0).reshape(1, 256, -1).astype(jnp.bfloat16)
    w_ref = weight.astype(jnp.bfloat16)
    ref = jnp.einsum(
        "oc,nch->noh", w_ref, x_ref, preferred_element_type=jnp.float32
    ).reshape(1, 1024, 14, 14)
    assert jnp.allclose(out, ref, atol=1e-2, rtol=1e-2)

    # Also sanity-check against the f32 reference with a bf16-appropriate tolerance.
    ref_f32 = jnp.einsum("nchw,oc->nohw", jnp.maximum(x, 0.0), weight)
    assert jnp.allclose(out, ref_f32, atol=5e-2, rtol=5e-2)

    print("KERNEL_OK")
</pallas_src>

<mosaic_0001>
module attributes {stable_mosaic.version = 11 : i64} {
  func.func @relu_conv1x1_kernel(%arg0: i32, %arg1: i32, %arg2: memref<1x256x196xbf16, #tpu.memory_space<vmem>>, %arg3: memref<512x256xbf16, #tpu.memory_space<vmem>>, %arg4: memref<1x512x196xf32, #tpu.memory_space<vmem>>) attributes {dimension_semantics = [#tpu.dimension_semantics<parallel>, #tpu.dimension_semantics<parallel>], iteration_bounds = array<i64: 2, 1>, scalar_prefetch = 0 : i64, scratch_operands = 0 : i64, tpu.core_type = #tpu.core_type<tc>, window_params = [{transform_indices = @transform_0, window_bounds = array<i64: 1, 256, 196>}, {transform_indices = @transform_1, window_bounds = array<i64: 512, 256>}, {transform_indices = @transform_2, window_bounds = array<i64: 1, 512, 196>}]} {
    %c0 = arith.constant 0 : index
    %c0_0 = arith.constant 0 : index
    %c0_1 = arith.constant 0 : index
    %0 = vector.load %arg2[%c0, %c0_0, %c0_1] : memref<1x256x196xbf16, #tpu.memory_space<vmem>>, vector<1x256x196xbf16>
    %1 = vector.shape_cast %0 : vector<1x256x196xbf16> to vector<256x196xbf16>
    %cst = arith.constant 0.000000e+00 : bf16
    %2 = vector.broadcast %cst : bf16 to vector<256x196xbf16>
    %3 = arith.maximumf %1, %2 : vector<256x196xbf16>
    %c0_2 = arith.constant 0 : index
    %c0_3 = arith.constant 0 : index
    %4 = vector.load %arg3[%c0_2, %c0_3] : memref<512x256xbf16, #tpu.memory_space<vmem>>, vector<512x256xbf16>
    %cst_4 = arith.constant dense<0.000000e+00> : vector<512x196xf32>
    %5 = tpu.matmul %4, %3, %cst_4 {dimension_numbers = #tpu.dot_dimension_numbers<[1], [0], [0], [1], [0, 0, 1, 1], [], []>} : vector<512x256xbf16>, vector<256x196xbf16>, vector<512x196xf32> -> vector<512x196xf32>
    %c0_5 = arith.constant 0 : index
    %c0_6 = arith.constant 0 : index
    %c0_7 = arith.constant 0 : index
    %6 = vector.load %arg4[%c0_5, %c0_6, %c0_7] : memref<1x512x196xf32, #tpu.memory_space<vmem>>, vector<1x512x196xf32>
    %7 = vector.shape_cast %6 : vector<1x512x196xf32> to vector<512x196xf32>
    %8 = vector.shape_cast %5 : vector<512x196xf32> to vector<1x512x196xf32>
    tpu.vector_store %arg4[%c0_5, %c0_6, %c0_7], %8 {strides = array<i32>} : memref<1x512x196xf32, #tpu.memory_space<vmem>>, vector<1x512x196xf32>,
    return
  }
  func.func @transform_0(%arg0: i32, %arg1: i32) -> (i32, i32, i32) {
    %c0_i32 = arith.constant 0 : i32
    %c0_i32_0 = arith.constant 0 : i32
    %c0_i32_1 = arith.constant 0 : i32
    return %arg1, %c0_i32, %c0_i32_0 : i32, i32, i32
  }
  func.func @transform_1(%arg0: i32, %arg1: i32) -> (i32, i32) {
    %c0_i32 = arith.constant 0 : i32
    %c0_i32_0 = arith.constant 0 : i32
    return %arg0, %c0_i32 : i32, i32
  }
  func.func @transform_2(%arg0: i32, %arg1: i32) -> (i32, i32, i32) {
    %c0_i32 = arith.constant 0 : i32
    %c0_i32_0 = arith.constant 0 : i32
    return %arg1, %arg0, %c0_i32 : i32, i32, i32
  }
}

</mosaic_0001>

<bundles_post_ra>
// kernel: tpu_custom_call.1
= control target key start
LH: loop header
LB: loop body
LE: loop exit
PB: predicated region body
PF: predicated region fallthrough
CT: control target
= control target key end

     0   :  { %7 = vsyncpa [#allocation3], 0  ;;  %s2328_s0 = inlined_call_operand.vmem [shape: bf16[1,256,196], index: 0, kind: input, shape index: {}]   ;;  %s2329_s1 = inlined_call_operand.hbm [shape: bf16[1024,256], index: 1, kind: input, shape index: {}]   ;;  %s2330_s2 = inlined_call_operand.vmem [shape: f32[1,1024,196], index: 2, kind: output, shape index: {}]  }
   0x1   :  { %9 = vsyncpa [#allocation3 + $0x1], 0  ;;  %s1817_s9 = smov 0   ;;  %s1819_s10 = smov 0  }
   0x2   :  { %s1821_s11 = smov 0   ;;  %s1823_s12 = smov 0  }
   0x3   :  { %s1825_s13 = smov 0   ;;  %s1827_s14 = smov 0  }
   0x4 LB: > { %s1415_s15 = sadd.s32 4294967295, %s1796_s14   ;;  %s27_s16 = sadd.s32 1, %s1792_s13  ;;  %s1796_s14 = sphi %s1827_s14, %s15_s14   ;;  %s1792_s13 = sphi %s1825_s13, %s2338_s13   ;;  %s1788_s12 = sphi %s1823_s12, %s2337_s12   ;;  %s1784_s11 = sphi %s1821_s11, %s2336_s11   ;;  %s1780_s10 = sphi %s1819_s10, %s2335_s10   ;;  %s1776_s9 = sphi %s1817_s9, %s2334_s9  }
   0x5   : > { %p29_p0 = scmp.ge.s32.totalorder %s27_s16, 2  ;;  %s60_s17 = sadd.s32 1, %s1784_s11 }
   0x6   : > { %p67_p1 = scmp.ne.s32.totalorder %s1784_s11, %s1780_s10  ;;  %p68_p2 = scmp.eq.s32.totalorder %s1796_s14, 0 }
   0x7   : > { %s2340_s16 = smov (%p29_p0, %s27_s16), 0  ;;  %p73_p4 = scmp.ne.s32.totalorder %s1780_s10, %s1776_s9 }
   0x8   : > { %p1853_p3 = por %p68_p2, %p67_p1  ;;  %s57_s19 = ssub.s32 %s1792_s13, %s2340_s16 }
   0x9   : > { %p74_p5 = scmp.eq.s32.totalorder %s1415_s15, 0  ;;  %p58_p6 = scmp.eq.s32.totalorder %s57_s19, 0 }
   0xa   : > { %p1568_p8 = scmp.lt.s32.totalorder %s1796_s14, 2  ;;  %s133_s22 = sand.u32 1, %s1784_s11  }
   0xb   : > { %p1860_p7 = por %p74_p5, %p73_p4  ;;  %s1528_s23 = sshll.u32 %s1792_s13, 13 }
   0xc   : > { %s1866_s21 = scalar_select %p58_p6, %s1784_s11, %s60_s17  }
   0xd   : > { %s1420_s24 = sshll.u32 %s133_s22, 9  ;;  %s1873_s27 = scalar_lea.hbm %s2329_s1, %s1528_s23 }
   0xe   : > { %s137_s28 = scalar_lea.vmem [#allocation2], %s1420_s24  ;;  %p1877_p9 = pnand %p1568_p8, %p1853_p3 }
   0xf   : > { %s145_s29 = sshll.u32 %s137_s28, 4  ;;  %s1883_s3 = scalar_lea.sflag [#allocation3], %s133_s22  ;;  %s1881_s29 = int_to_ptr.vmem [resolvable:$true] %s145_s29 }
  0x10   : > { %s1716_s4 = scalar_lea.hbm %s1873_s27, 8192  ;;  %p1718_p11 = pneg %p1877_p9 }
  0x11   : > { %p1717_p10 = scmp.ne.s32.totalorder %s1873_s27, %s1716_s4  ;;  %s1721_s7 = scalar_lea.hbm %s2329_s1, 16384 }
  0x12   : > { %p1722_p0 = scmp.lt.u32.totalorder %s1873_s27, %s2329_s1  ;;  %p1723_p1 = scmp.lt.u32.totalorder %s1721_s7, %s1716_s4 }
  0x13   : > { %p1719_p12 = pnand %p1718_p11, %p1717_p10  ;;  %p1725_p3 = scmp.lt.u32.totalorder %s1716_s4, %s1873_s27 }
  0x14   : > { %p1724_p2 = por %p1723_p1, %p1722_p0 }
  0x15   : > { %p1720_p13 = pneg %p1719_p12 }
  0x16   : > { %p1726_p4 = por %p1725_p3, %p1724_p2 }
  0x18   : > { %p1727_p5 = pnand %p1726_p4, %p1720_p13 }
  0x1a   : > { %1730 = shalt.err (!%p1727_p5)
}
  0x1b   : > { %s1731_s15 = scalar_lea.vmem %s1881_s29, 8192  ;;  %s1798_s17 = smov [#allocation2]  }
  0x1c   : > { %p1732_p6 = scmp.ne.s32.totalorder %s1881_s29, %s1731_s15  ;;  %s1736_s18 = sshll.u32 %s1798_s17, 4  ;;  %s1737_s18 = int_to_ptr.vmem [resolvable:$false] %s1736_s18 }
  0x1d   : > { %s1738_s19 = scalar_lea.vmem %s1737_s18, 16384  ;;  %p1739_p12 = scmp.lt.s32.totalorder %s1881_s29, %s1737_s18 }
  0x1e   : > { %p1734_p8 = pnand %p1732_p6, %p1718_p11  ;;  %p1740_p0 = scmp.lt.s32.totalorder %s1738_s19, %s1731_s15 }
  0x20   : > { %p1735_p10 = pneg %p1734_p8  ;;  %p1741_p1 = por %p1740_p0, %p1739_p12 }
  0x22   : > { %p1742_p2 = pnand %p1741_p1, %p1735_p10 }
  0x24   : > { %1745 = shalt.err (!%p1742_p2)
}
  0x25   : > { %s1799_s22 = smov 128   ;;  %s1800_s23 = smov 8  }
  0x26   : > { %1567 = dma.hbm_to_vmem [thread:$0]  (!%p1877_p9), %s1873_s27, 8192, %s1881_s29, %s1883_s3, %s1799_s22, %s1799_s22, %s1800_s23  }
  0x27   : > { %p1424_p11 = scmp.ge.s32.totalorder %s1796_s14, 1  ;;  %p153_p13 = scmp.lt.s32.totalorder %s1796_s14, 3 }
  0x29   : > { %p154_p3 = pnand %p1424_p11, %p153_p13 }
  0x2a   : > { %s159_s24 = sand.u32 (!%p154_p3), 1, %s1780_s10  }
  0x2b   : > { %157 = sbr.rel (%p154_p3) target bundleno = 456 (0x1c8), region = 28  ;;  %s1425_s25 = sshll.u32 (!%p154_p3), %s159_s24, 9 }
  0x2c   : > { %s160_s26 = scalar_lea.sflag (!%p154_p3), [#allocation3], %s159_s24  ;;  %s1914_s28 = scalar_lea.vmem (!%p154_p3), [#allocation2], %s1425_s25 }
  0x32   : > { %1771 = dma.done.wait (%p1860_p7), %s160_s26, 8192  }
  0x33   : > { %1773 = vsyncadd (%p1860_p7), %s160_s26, 4294959104  ;;  %v212_v0 = vld [vmem:[%s2328_s0] sm:$0xff]  ;;  %v213_v1 = vld [vmem:[%s2328_s0 + $0x8] sm:$0xff]  ;;  %v1801_v3 = vmov 0   ;;  %s1426_s30 = sshll.u32 %s1788_s12, 6  ;;  %vm1174_vm0 = vcmask 556032  }
  0x34   : > { %v214_v2 = vld [vmem:[%s2328_s0 + $0x10] sm:$0xff]  ;;  %v244_v4 = vmax.bf16 %v1801_v3, %v212_v0  ;;  %v245_v5 = vmax.bf16 %v1801_v3, %v213_v1  ;;  %v215_v6 = vld [vmem:[%s2328_s0 + $0x18] sm:$0xff]  ;;  %v216_v8 = vld [vmem:[%s2328_s0 + $0x20] sm:$0xff]  ;;  %p203_p7 = scmp.lt.s32.totalorder %s1426_s30, 127 }
  0x35   : > { %v246_v7 = vmax.bf16 %v1801_v3, %v214_v2  ;;  %v217_v9 = vld [vmem:[%s2328_s0 + $0x28] sm:$0xff]  ;;  %v247_v10 = vmax.bf16 %v1801_v3, %v215_v6  ;;  %v248_v13 = vmax.bf16 %v1801_v3, %v216_v8  ;;  %v218_v16 = vld [vmem:[%s2328_s0 + $0x30] sm:$0xff]  ;;  %v219_v17 = vld [vmem:[%s2328_s0 + $0x38] sm:$0xff] }
  0x36   : > { %v1494_v11 = vcombine.high %v244_v4, %v245_v5  ;;  %v1493_v12 = vcombine.low %v244_v4, %v245_v5  ;;  %v249_v14 = vmax.bf16 %v1801_v3, %v217_v9  ;;  %v250_v20 = vmax.bf16 %v1801_v3, %v218_v16  ;;  %v220_v22 = vld [vmem:[%s2328_s0 + $0x40] sm:$0xff]  ;;  %v221_v23 = vld [vmem:[%s2328_s0 + $0x48] sm:$0xff]  ;;  %v222_v28 = vld [vmem:[%s2328_s0 + $0x50] sm:$0xff]  ;;  %s2342_s30 = smov (!%p203_p7, %s1426_s30), 127 }
  0x37   : > { %v1496_v15 = vcombine.high %v246_v7, %v247_v10  ;;  %v1495_v18 = vcombine.low %v246_v7, %v247_v10  ;;  %v251_v21 = vmax.bf16 %v1801_v3, %v219_v17  ;;  %v252_v26 = vmax.bf16 %v1801_v3, %v220_v22  ;;  %v1622_v29 = vld [vmem:[%s1914_s28 + $0x4] ss:$8 sps:$4 sm:$0xff]   ;;  %v223_v30 = vld [vmem:[%s2328_s0 + $0x58] sm:$0xff]  ;;  %v226_v42 = vld [vmem:[%s2328_s0 + $0x70] sm:$0xff]  ;;  %s1529_s3 = sshll.u32 %s2342_s30, 4 }
  0x38   : > { %820 = vmatprep.subr.bf16.mxu0 %v1494_v11  ;;  %1530 = vmatprep.subr.bf16.mxu1 %v1494_v11  ;;  %v1498_v19 = vcombine.high %v248_v13, %v249_v14  ;;  %v1497_v24 = vcombine.low %v248_v13, %v249_v14  ;;  %v253_v27 = vmax.bf16 %v1801_v3, %v221_v23  ;;  %v1625_v31 = vld [vmem:[%s1914_s28 + $0x104] ss:$8 sps:$4 sm:$0xff]   ;;  %v227_v43 = vld [vmem:[%s2328_s0 + $0x78] sm:$0xff]  ;;  %v230_v54 = vld [vmem:[%s2328_s0 + $0x90] sm:$0xff]  ;;  %s2116_s7 = scalar_lea.vmem %s2330_s2, %s1529_s3 }
  0x39   : > { %821 = vmatpush1.bf16.msra.mxu0 %v1493_v12  ;;  %1546 = vmatpush1.bf16.msra.mxu1 %v1493_v12  ;;  %v1500_v25 = vcombine.high %v250_v20, %v251_v21  ;;  %v1499_v32 = vcombine.low %v250_v20, %v251_v21  ;;  %v254_v34 = vmax.bf16 %v1801_v3, %v222_v28  ;;  %v224_v36 = vld [vmem:[%s2328_s0 + $0x60] sm:$0xff]  ;;  %v225_v37 = vld [vmem:[%s2328_s0 + $0x68] sm:$0xff]  ;;  %v231_v55 = vld [vmem:[%s2328_s0 + $0x98] sm:$0xff] }
  0x3a   : > { %822 = vmatprep.subr.bf16.mxu0 %v1496_v15  ;;  %1531 = vmatprep.subr.bf16.mxu1 %v1496_v15  ;;  %v1502_v33 = vcombine.high %v252_v26, %v253_v27  ;;  %v255_v35 = vmax.bf16 %v1801_v3, %v223_v30  ;;  %v1501_v38 = vcombine.low %v252_v26, %v253_v27  ;;  %v228_v48 = vld [vmem:[%s2328_s0 + $0x80] sm:$0xff]  ;;  %v229_v49 = vld [vmem:[%s2328_s0 + $0x88] sm:$0xff]  ;;  %v234_v2 = vld [vmem:[%s2328_s0 + $0xb0] sm:$0xff] }
  0x3b   : > { %852 = vmatprep.mubr.bf16.mxu0 %v1622_v29  ;;  %1012 = vmatprep.mubr.bf16.mxu1 %v1625_v31  ;;  %v256_v40 = vmax.bf16 %v1801_v3, %v224_v36  ;;  %v257_v41 = vmax.bf16 %v1801_v3, %v225_v37  ;;  %v258_v46 = vmax.bf16 %v1801_v3, %v226_v42  ;;  %v232_v60 = vld [vmem:[%s2328_s0 + $0xa0] sm:$0xff]  ;;  %v233_v61 = vld [vmem:[%s2328_s0 + $0xa8] sm:$0xff]  ;;  %v235_v4 = vld [vmem:[%s2328_s0 + $0xb8] sm:$0xff] }
  0x3c   : > { %v1504_v39 = vcombine.high %v254_v34, %v255_v35  ;;  %v1503_v44 = vcombine.low %v254_v34, %v255_v35  ;;  %v259_v47 = vmax.bf16 %v1801_v3, %v227_v43  ;;  %v260_v52 = vmax.bf16 %v1801_v3, %v228_v48  ;;  %v236_v9 = vld [vmem:[%s2328_s0 + $0xc0] sm:$0xff]  ;;  %v237_v10 = vld [vmem:[%s2328_s0 + $0xc8] sm:$0xff]  ;;  %v238_v15 = vld [vmem:[%s2328_s0 + $0xd0] sm:$0xff] }
  0x3d   : > { %823 = vmatpush1.bf16.msra.mxu0 %v1495_v18  ;;  %1547 = vmatpush1.bf16.msra.mxu1 %v1495_v18  ;;  %v1506_v45 = vcombine.high %v256_v40, %v257_v41  ;;  %v1505_v50 = vcombine.low %v256_v40, %v257_v41  ;;  %v261_v53 = vmax.bf16 %v1801_v3, %v229_v49  ;;  %v239_v16 = vld [vmem:[%s2328_s0 + $0xd8] sm:$0xff]  ;;  %v240_v21 = vld [vmem:[%s2328_s0 + $0xe0] sm:$0xff]  ;;  %v241_v22 = vld [vmem:[%s2328_s0 + $0xe8] sm:$0xff] }
  0x3e   : > { %824 = vmatprep.subr.bf16.mxu0 %v1498_v19  ;;  %1532 = vmatprep.subr.bf16.mxu1 %v1498_v19  ;;  %v1508_v51 = vcombine.high %v258_v46, %v259_v47  ;;  %v1507_v56 = vcombine.low %v258_v46, %v259_v47  ;;  %v262_v58 = vmax.bf16 %v1801_v3, %v230_v54  ;;  %v242_v27 = vld [vmem:[%s2328_s0 + $0xf0] sm:$0xff]  ;;  %v243_v28 = vld [vmem:[%s2328_s0 + $0xf8] sm:$0xff]  ;;  %v1620_v36 = vld [vmem:[%s1914_s28] ss:$8 sps:$4 sm:$0xff]  }
  0x3f   : > { %v1510_v57 = vcombine.high %v260_v52, %v261_v53  ;;  %v263_v59 = vmax.bf16 %v1801_v3, %v231_v55  ;;  %v1509_v62 = vcombine.low %v260_v52, %v261_v53  ;;  %v264_v0 = vmax.bf16 %v1801_v3, %v232_v60  ;;  %v1623_v37 = vld [vmem:[%s1914_s28 + $0x100] ss:$8 sps:$4 sm:$0xff]   ;;  %v1631_v40 = vld [vmem:[%s1914_s28 + $0x110] ss:$8 sps:$4 sm:$0xff]   ;;  %v1632_v41 = vld [vmem:[%s1914_s28 + $0x24] ss:$8 sps:$4 sm:$0xff]  }
  0x40   : > { %v265_v1 = vmax.bf16 %v1801_v3, %v233_v61  ;;  %v266_v7 = vmax.bf16 %v1801_v3, %v234_v2  ;;  %v267_v8 = vmax.bf16 %v1801_v3, %v235_v4  ;;  %v268_v13 = vmax.bf16 %v1801_v3, %v236_v9  ;;  %v1634_v42 = vld [vmem:[%s1914_s28 + $0x124] ss:$8 sps:$4 sm:$0xff]   ;;  %v1636_v43 = vld [vmem:[%s1914_s28 + $0x20] ss:$8 sps:$4 sm:$0xff]   ;;  %v1640_v46 = vld [vmem:[%s1914_s28 + $0x134] ss:$8 sps:$4 sm:$0xff]  }
  0x41   : > { %825 = vmatpush1.bf16.msra.mxu0 %v1497_v24  ;;  %1548 = vmatpush1.bf16.msra.mxu1 %v1497_v24  ;;  %v1512_v63 = vcombine.high %v262_v58, %v263_v59  ;;  %v1511_v5 = vcombine.low %v262_v58, %v263_v59  ;;  %v269_v14 = vmax.bf16 %v1801_v3, %v237_v10  ;;  %v1642_v47 = vld [vmem:[%s1914_s28 + $0x30] ss:$8 sps:$4 sm:$0xff]   ;;  %v1644_v49 = vld [vmem:[%s1914_s28 + $0x44] ss:$8 sps:$4 sm:$0xff]   ;;  %v1649_v52 = vld [vmem:[%s1914_s28 + $0x140] ss:$8 sps:$4 sm:$0xff]  }
  0x42   : > { %826 = vmatprep.subr.bf16.mxu0 %v1500_v25  ;;  %1533 = vmatprep.subr.bf16.mxu1 %v1500_v25  ;;  %v1514_v6 = vcombine.high %v264_v0, %v265_v1  ;;  %v1513_v11 = vcombine.low %v264_v0, %v265_v1  ;;  %v1516_v12 = vcombine.high %v266_v7, %v267_v8  ;;  %v1643_v48 = vld [vmem:[%s1914_s28 + $0x130] ss:$8 sps:$4 sm:$0xff]   ;;  %v1650_v53 = vld [vmem:[%s1914_s28 + $0x54] ss:$8 sps:$4 sm:$0xff]   ;;  %v1658_v58 = vld [vmem:[%s1914_s28 + $0x164] ss:$8 sps:$4 sm:$0xff]  }
  0x43   : > { %v1515_v17 = vcombine.low %v266_v7, %v267_v8  ;;  %v1518_v18 = vcombine.high %v268_v13, %v269_v14  ;;  %v270_v19 = vmax.bf16 %v1801_v3, %v238_v15  ;;  %v271_v20 = vmax.bf16 %v1801_v3, %v239_v16  ;;  %v1652_v54 = vld [vmem:[%s1914_s28 + $0x154] ss:$8 sps:$4 sm:$0xff]   ;;  %v1654_v55 = vld [vmem:[%s1914_s28 + $0x50] ss:$8 sps:$4 sm:$0xff]   ;;  %v1660_v59 = vld [vmem:[%s1914_s28 + $0x60] ss:$8 sps:$4 sm:$0xff]  }
  0x44   : > { %v1517_v23 = vcombine.low %v268_v13, %v269_v14  ;;  %v272_v25 = vmax.bf16 %v1801_v3, %v240_v21  ;;  %v273_v26 = vmax.bf16 %v1801_v3, %v241_v22  ;;  %v274_v31 = vmax.bf16 %v1801_v3, %v242_v27  ;;  %v1661_v60 = vld [vmem:[%s1914_s28 + $0x160] ss:$8 sps:$4 sm:$0xff]   ;;  %v1662_v61 = vld [vmem:[%s1914_s28 + $0x74] ss:$8 sps:$4 sm:$0xff]   ;;  %v1667_v0 = vld [vmem:[%s1914_s28 + $0x170] ss:$8 sps:$4 sm:$0xff]  }
  0x45   : > { %827 = vmatpush1.bf16.msra.mxu0 %v1499_v32  ;;  %1549 = vmatpush1.bf16.msra.mxu1 %v1499_v32  ;;  %v1520_v24 = vcombine.high %v270_v19, %v271_v20  ;;  %v1519_v29 = vcombine.low %v270_v19, %v271_v20  ;;  %v275_v32 = vmax.bf16 %v1801_v3, %v243_v28  ;;  %v1626_v3 = vld [vmem:[%s1914_s28 + $0x14] ss:$8 sps:$4 sm:$0xff]   ;;  %v1668_v1 = vld [vmem:[%s1914_s28 + $0x84] ss:$8 sps:$4 sm:$0xff]   ;;  %v1672_v4 = vld [vmem:[%s1914_s28 + $0x80] ss:$8 sps:$4 sm:$0xff]  }
  0x46   : > { %828 = vmatprep.subr.bf16.mxu0 %v1502_v33  ;;  %1534 = vmatprep.subr.bf16.mxu1 %v1502_v33  ;;  %v1522_v30 = vcombine.high %v272_v25, %v273_v26  ;;  %v1521_v33 = vcombine.low %v272_v25, %v273_v26  ;;  %v1670_v2 = vld [vmem:[%s1914_s28 + $0x184] ss:$8 sps:$4 sm:$0xff]   ;;  %v1676_v7 = vld [vmem:[%s1914_s28 + $0x194] ss:$8 sps:$4 sm:$0xff]   ;;  %v1678_v8 = vld [vmem:[%s1914_s28 + $0x90] ss:$8 sps:$4 sm:$0xff]  }
  0x47   : > { %v1524_v34 = vcombine.high %v274_v31, %v275_v32  ;;  %v1523_v35 = vcombine.low %v274_v31, %v275_v32  ;;  %v1679_v9 = vld [vmem:[%s1914_s28 + $0x190] ss:$8 sps:$4 sm:$0xff]   ;;  %v1680_v10 = vld [vmem:[%s1914_s28 + $0xa4] ss:$8 sps:$4 sm:$0xff]   ;;  %v1685_v13 = vld [vmem:[%s1914_s28 + $0x1a0] ss:$8 sps:$4 sm:$0xff]  }
  0x48   : > { %v1686_v14 = vld [vmem:[%s1914_s28 + $0xb4] ss:$8 sps:$4 sm:$0xff]   ;;  %v1690_v16 = vld [vmem:[%s1914_s28 + $0xb0] ss:$8 sps:$4 sm:$0xff]   ;;  %v1694_v19 = vld [vmem:[%s1914_s28 + $0x1c4] ss:$8 sps:$4 sm:$0xff]  }
  0x49   : > { %829 = vmatpush1.bf16.msra.mxu0 %v1501_v38  ;;  %1550 = vmatpush1.bf16.msra.mxu1 %v1501_v38  ;;  %v1628_v38 = vld [vmem:[%s1914_s28 + $0x114] ss:$8 sps:$4 sm:$0xff]   ;;  %v1696_v20 = vld [vmem:[%s1914_s28 + $0xc0] ss:$8 sps:$4 sm:$0xff]   ;;  %v1703_v25 = vld [vmem:[%s1914_s28 + $0x1d0] ss:$8 sps:$4 sm:$0xff]  }
  0x4a   : > { %830 = vmatprep.subr.bf16.mxu0 %v1504_v39  ;;  %1535 = vmatprep.subr.bf16.mxu1 %v1504_v39  ;;  %v1630_v39 = vld [vmem:[%s1914_s28 + $0x10] ss:$8 sps:$4 sm:$0xff]   ;;  %v1688_v15 = vld [vmem:[%s1914_s28 + $0x1b4] ss:$8 sps:$4 sm:$0xff]   ;;  %v1697_v21 = vld [vmem:[%s1914_s28 + $0x1c0] ss:$8 sps:$4 sm:$0xff]  }
  0x4b   : > { %v1698_v22 = vld [vmem:[%s1914_s28 + $0xd4] ss:$8 sps:$4 sm:$0xff]   ;;  %v1704_v26 = vld [vmem:[%s1914_s28 + $0xe4] ss:$8 sps:$4 sm:$0xff]   ;;  %v1708_v28 = vld [vmem:[%s1914_s28 + $0xe0] ss:$8 sps:$4 sm:$0xff]  }
  0x4c   : > { %v1706_v27 = vld [vmem:[%s1914_s28 + $0x1e4] ss:$8 sps:$4 sm:$0xff]   ;;  %v1712_v31 = vld [vmem:[%s1914_s28 + $0x1f4] ss:$8 sps:$4 sm:$0xff]   ;;  %v1714_v32 = vld [vmem:[%s1914_s28 + $0xf0] ss:$8 sps:$4 sm:$0xff]  }
  0x4d   : > { %831 = vmatpush1.bf16.msra.mxu0 %v1503_v44  ;;  %1551 = vmatpush1.bf16.msra.mxu1 %v1503_v44  ;;  %v1637_v44 = vld [vmem:[%s1914_s28 + $0x120] ss:$8 sps:$4 sm:$0xff]  }
  0x4e   : > { %832 = vmatprep.subr.bf16.mxu0 %v1506_v45  ;;  %1536 = vmatprep.subr.bf16.mxu1 %v1506_v45  ;;  %v1638_v45 = vld [vmem:[%s1914_s28 + $0x34] ss:$8 sps:$4 sm:$0xff]  }
  0x51   : > { %833 = vmatpush1.bf16.msra.mxu0 %v1505_v50  ;;  %1552 = vmatpush1.bf16.msra.mxu1 %v1505_v50  ;;  %v1646_v50 = vld [vmem:[%s1914_s28 + $0x144] ss:$8 sps:$4 sm:$0xff]  }
  0x52   : > { %834 = vmatprep.subr.bf16.mxu0 %v1508_v51  ;;  %1537 = vmatprep.subr.bf16.mxu1 %v1508_v51  ;;  %v1648_v51 = vld [vmem:[%s1914_s28 + $0x40] ss:$8 sps:$4 sm:$0xff]  }
  0x55   : > { %835 = vmatpush1.bf16.msra.mxu0 %v1507_v56  ;;  %1553 = vmatpush1.bf16.msra.mxu1 %v1507_v56  ;;  %v1655_v56 = vld [vmem:[%s1914_s28 + $0x150] ss:$8 sps:$4 sm:$0xff]  }
  0x56   : > { %836 = vmatprep.subr.bf16.mxu0 %v1510_v57  ;;  %1538 = vmatprep.subr.bf16.mxu1 %v1510_v57  ;;  %v1656_v57 = vld [vmem:[%s1914_s28 + $0x64] ss:$8 sps:$4 sm:$0xff]  }
  0x59   : > { %837 = vmatpush1.bf16.msra.mxu0 %v1509_v62  ;;  %1554 = vmatpush1.bf16.msra.mxu1 %v1509_v62  ;;  %v1664_v62 = vld [vmem:[%s1914_s28 + $0x174] ss:$8 sps:$4 sm:$0xff]  }
  0x5a   : > { %838 = vmatprep.subr.bf16.mxu0 %v1512_v63  ;;  %1539 = vmatprep.subr.bf16.mxu1 %v1512_v63  ;;  %v1666_v63 = vld [vmem:[%s1914_s28 + $0x70] ss:$8 sps:$4 sm:$0xff]  }
  0x5d   : > { %839 = vmatpush1.bf16.msra.mxu0 %v1511_v5  ;;  %1555 = vmatpush1.bf16.msra.mxu1 %v1511_v5  ;;  %v1673_v5 = vld [vmem:[%s1914_s28 + $0x180] ss:$8 sps:$4 sm:$0xff]  }
  0x5e   : > { %840 = vmatprep.subr.bf16.mxu0 %v1514_v6  ;;  %1540 = vmatprep.subr.bf16.mxu1 %v1514_v6  ;;  %v1674_v6 = vld [vmem:[%s1914_s28 + $0x94] ss:$8 sps:$4 sm:$0xff]  }
  0x61   : > { %841 = vmatpush1.bf16.msra.mxu0 %v1513_v11  ;;  %1556 = vmatpush1.bf16.msra.mxu1 %v1513_v11  ;;  %v1682_v11 = vld [vmem:[%s1914_s28 + $0x1a4] ss:$8 sps:$4 sm:$0xff]  }
  0x62   : > { %842 = vmatprep.subr.bf16.mxu0 %v1516_v12  ;;  %1541 = vmatprep.subr.bf16.mxu1 %v1516_v12  ;;  %v1684_v12 = vld [vmem:[%s1914_s28 + $0xa0] ss:$8 sps:$4 sm:$0xff]  }
  0x65   : > { %843 = vmatpush1.bf16.msra.mxu0 %v1515_v17  ;;  %1557 = vmatpush1.bf16.msra.mxu1 %v1515_v17  ;;  %v1691_v17 = vld [vmem:[%s1914_s28 + $0x1b0] ss:$8 sps:$4 sm:$0xff]  }
  0x66   : > { %844 = vmatprep.subr.bf16.mxu0 %v1518_v18  ;;  %1542 = vmatprep.subr.bf16.mxu1 %v1518_v18  ;;  %v1692_v18 = vld [vmem:[%s1914_s28 + $0xc4] ss:$8 sps:$4 sm:$0xff]  }
  0x69   : > { %845 = vmatpush1.bf16.msra.mxu0 %v1517_v23  ;;  %1558 = vmatpush1.bf16.msra.mxu1 %v1517_v23  ;;  %v1700_v23 = vld [vmem:[%s1914_s28 + $0x1d4] ss:$8 sps:$4 sm:$0xff]  }
  0x6a   : > { %846 = vmatprep.subr.bf16.mxu0 %v1520_v24  ;;  %1543 = vmatprep.subr.bf16.mxu1 %v1520_v24  ;;  %v1702_v24 = vld [vmem:[%s1914_s28 + $0xd0] ss:$8 sps:$4 sm:$0xff]  }
  0x6d   : > { %847 = vmatpush1.bf16.msra.mxu0 %v1519_v29  ;;  %1559 = vmatpush1.bf16.msra.mxu1 %v1519_v29  ;;  %v1709_v29 = vld [vmem:[%s1914_s28 + $0x1e0] ss:$8 sps:$4 sm:$0xff]  }
  0x6e   : > { %848 = vmatprep.subr.bf16.mxu0 %v1522_v30  ;;  %1544 = vmatprep.subr.bf16.mxu1 %v1522_v30  ;;  %v1710_v30 = vld [vmem:[%s1914_s28 + $0xf4] ss:$8 sps:$4 sm:$0xff]  }
  0x71   : > { %849 = vmatpush1.bf16.msra.mxu0 %v1521_v33  ;;  %1560 = vmatpush1.bf16.msra.mxu1 %v1521_v33  ;;  %v1715_v33 = vld [vmem:[%s1914_s28 + $0x1f0] ss:$8 sps:$4 sm:$0xff]  }
  0x72   : > { %850 = vmatprep.subr.bf16.mxu0 %v1524_v34  ;;  %1545 = vmatprep.subr.bf16.mxu1 %v1524_v34 }
  0x75   : > { %851 = vmatpush1.bf16.msra.mxu0 %v1523_v35  ;;  %1561 = vmatpush1.bf16.msra.mxu1 %v1523_v35 }
  0x78   : > { %853 = vmatmul.mubr.bf16.vlgmr.msra.gmra.mrb[0].mxu0 %v1620_v36  ;;  %1013 = vmatmul.mubr.bf16.vlgmr.msra.gmra.mrb[0].mxu1 %v1623_v37 }
  0x79   : > { %862 = vmatprep.mubr.bf16.mxu0 %v1626_v3  ;;  %1022 = vmatprep.mubr.bf16.mxu1 %v1628_v38 }
  0x80   : > { %863 = vmatmul.mubr.bf16.gmra.mrb[4].mxu0 %v1630_v39  ;;  %1023 = vmatmul.mubr.bf16.gmra.mrb[4].mxu1 %v1631_v40 }
  0x81   : > { %872 = vmatprep.mubr.bf16.mxu0 %v1632_v41  ;;  %1032 = vmatprep.mubr.bf16.mxu1 %v1634_v42 }
  0x88   : > { %873 = vmatmul.mubr.bf16.gmra.mrb[8].mxu0 %v1636_v43  ;;  %1033 = vmatmul.mubr.bf16.gmra.mrb[8].mxu1 %v1637_v44 }
  0x89   : > { %882 = vmatprep.mubr.bf16.mxu0 %v1638_v45  ;;  %1042 = vmatprep.mubr.bf16.mxu1 %v1640_v46 }
  0x90   : > { %883 = vmatmul.mubr.bf16.gmra.mrb[12].mxu0 %v1642_v47  ;;  %1043 = vmatmul.mubr.bf16.gmra.mrb[12].mxu1 %v1643_v48 }
  0x91   : > { %892 = vmatprep.mubr.bf16.mxu0 %v1644_v49  ;;  %1052 = vmatprep.mubr.bf16.mxu1 %v1646_v50 }
  0x98   : > { %893 = vmatmul.mubr.bf16.gmra.mrb[16].mxu0 %v1648_v51  ;;  %1053 = vmatmul.mubr.bf16.gmra.mrb[16].mxu1 %v1649_v52 }
  0x99   : > { %902 = vmatprep.mubr.bf16.mxu0 %v1650_v53  ;;  %1062 = vmatprep.mubr.bf16.mxu1 %v1652_v54 }
  0xa0   : > { %903 = vmatmul.mubr.bf16.gmra.mrb[20].mxu0 %v1654_v55  ;;  %1063 = vmatmul.mubr.bf16.gmra.mrb[20].mxu1 %v1655_v56 }
  0xa1   : > { %912 = vmatprep.mubr.bf16.mxu0 %v1656_v57  ;;  %1072 = vmatprep.mubr.bf16.mxu1 %v1658_v58 }
  0xa8   : > { %913 = vmatmul.mubr.bf16.gmra.mrb[24].mxu0 %v1660_v59  ;;  %1073 = vmatmul.mubr.bf16.gmra.mrb[24].mxu1 %v1661_v60 }
  0xa9   : > { %922 = vmatprep.mubr.bf16.mxu0 %v1662_v61  ;;  %1082 = vmatprep.mubr.bf16.mxu1 %v1664_v62 }
  0xb0   : > { %923 = vmatmul.mubr.bf16.gmra.mrb[28].mxu0 %v1666_v63  ;;  %1083 = vmatmul.mubr.bf16.gmra.mrb[28].mxu1 %v1667_v0 }
  0xb1   : > { %932 = vmatprep.mubr.bf16.mxu0 %v1668_v1  ;;  %1092 = vmatprep.mubr.bf16.mxu1 %v1670_v2 }
  0xb8   : > { %933 = vmatmul.mubr.bf16.gmra.mrb[32].mxu0 %v1672_v4  ;;  %1093 = vmatmul.mubr.bf16.gmra.mrb[32].mxu1 %v1673_v5 }
  0xb9   : > { %942 = vmatprep.mubr.bf16.mxu0 %v1674_v6  ;;  %1102 = vmatprep.mubr.bf16.mxu1 %v1676_v7 }
  0xc0   : > { %943 = vmatmul.mubr.bf16.gmra.mrb[36].mxu0 %v1678_v8  ;;  %1103 = vmatmul.mubr.bf16.gmra.mrb[36].mxu1 %v1679_v9 }
  0xc1   : > { %952 = vmatprep.mubr.bf16.mxu0 %v1680_v10  ;;  %1112 = vmatprep.mubr.bf16.mxu1 %v1682_v11 }
  0xc8   : > { %953 = vmatmul.mubr.bf16.gmra.mrb[40].mxu0 %v1684_v12  ;;  %1113 = vmatmul.mubr.bf16.gmra.mrb[40].mxu1 %v1685_v13 }
  0xc9   : > { %962 = vmatprep.mubr.bf16.mxu0 %v1686_v14  ;;  %1122 = vmatprep.mubr.bf16.mxu1 %v1688_v15 }
  0xd0   : > { %963 = vmatmul.mubr.bf16.gmra.mrb[44].mxu0 %v1690_v16  ;;  %1123 = vmatmul.mubr.bf16.gmra.mrb[44].mxu1 %v1691_v17 }
  0xd1   : > { %972 = vmatprep.mubr.bf16.mxu0 %v1692_v18  ;;  %1132 = vmatprep.mubr.bf16.mxu1 %v1694_v19 }
  0xd8   : > { %973 = vmatmul.mubr.bf16.gmra.mrb[48].mxu0 %v1696_v20  ;;  %1133 = vmatmul.mubr.bf16.gmra.mrb[48].mxu1 %v1697_v21 }
  0xd9   : > { %982 = vmatprep.mubr.bf16.mxu0 %v1698_v22  ;;  %1142 = vmatprep.mubr.bf16.mxu1 %v1700_v23 }
  0xe0   : > { %983 = vmatmul.mubr.bf16.gmra.mrb[52].mxu0 %v1702_v24  ;;  %1143 = vmatmul.mubr.bf16.gmra.mrb[52].mxu1 %v1703_v25 }
  0xe1   : > { %992 = vmatprep.mubr.bf16.mxu0 %v1704_v26  ;;  %1152 = vmatprep.mubr.bf16.mxu1 %v1706_v27 }
  0xe8   : > { %993 = vmatmul.mubr.bf16.gmra.mrb[56].mxu0 %v1708_v28  ;;  %1153 = vmatmul.mubr.bf16.gmra.mrb[56].mxu1 %v1709_v29 }
  0xe9   : > { %1002 = vmatprep.mubr.bf16.mxu0 %v1710_v30  ;;  %1162 = vmatprep.mubr.bf16.mxu1 %v1712_v31 }
  0xf0   : > { %1003 = vmatmul.mubr.bf16.gmra.mrb[60].mxu0 %v1714_v32  ;;  %1163 = vmatmul.mubr.bf16.gmra.mrb[60].mxu1 %v1715_v33 }
 0x14b   : > { %v854_v34 = vpop.f32.mrb[0].mxu0  ;;  %v1014_v35 = vpop.f32.mrb[0].mxu1 }
 0x14c   : > { %1173 = vst [vmem:[%s2116_s7] sm:$0xff] %v854_v34  ;;  %1238 = vst [vmem:[%s2116_s7 + $0x200] sm:$0xff] %v1014_v35  ;;  %v856_v36 = vpop.f32.mrb[1].mxu0  ;;  %v1016_v37 = vpop.f32.mrb[1].mxu1 }
 0x14d   : > { %1175 = vst.msk [vmem:[%s2116_s7 + $0x8] sm:$0xff] %vm1174_vm0, %v856_v36  ;;  %1239 = vst.msk [vmem:[%s2116_s7 + $0x208] sm:$0xff] %vm1174_vm0, %v1016_v37  ;;  %v858_v3 = vpop.f32.mrb[2].mxu0  ;;  %v1018_v38 = vpop.f32.mrb[2].mxu1 }
 0x14e   : > { %1176 = vst [vmem:[%s2116_s7 + $0x10] sm:$0xff] %v858_v3  ;;  %1240 = vst [vmem:[%s2116_s7 + $0x210] sm:$0xff] %v1018_v38  ;;  %v860_v39 = vpop.f32.mrb[3].mxu0  ;;  %v1020_v40 = vpop.f32.mrb[3].mxu1 }
 0x14f   : > { %1177 = vst.msk [vmem:[%s2116_s7 + $0x18] sm:$0xff] %vm1174_vm0, %v860_v39  ;;  %1241 = vst.msk [vmem:[%s2116_s7 + $0x218] sm:$0xff] %vm1174_vm0, %v1020_v40 }
 0x153   : > { %v864_v41 = vpop.f32.mrb[4].mxu0  ;;  %v1024_v42 = vpop.f32.mrb[4].mxu1 }
 0x154   : > { %1178 = vst [vmem:[%s2116_s7 + $0x20] sm:$0xff] %v864_v41  ;;  %1242 = vst [vmem:[%s2116_s7 + $0x220] sm:$0xff] %v1024_v42  ;;  %v866_v43 = vpop.f32.mrb[5].mxu0  ;;  %v1026_v44 = vpop.f32.mrb[5].mxu1 }
 0x155   : > { %1179 = vst.msk [vmem:[%s2116_s7 + $0x28] sm:$0xff] %vm1174_vm0, %v866_v43  ;;  %1243 = vst.msk [vmem:[%s2116_s7 + $0x228] sm:$0xff] %vm1174_vm0, %v1026_v44  ;;  %v868_v45 = vpop.f32.mrb[6].mxu0  ;;  %v1028_v46 = vpop.f32.mrb[6].mxu1 }
 0x156   : > { %1180 = vst [vmem:[%s2116_s7 + $0x30] sm:$0xff] %v868_v45  ;;  %1244 = vst [vmem:[%s2116_s7 + $0x230] sm:$0xff] %v1028_v46  ;;  %v870_v47 = vpop.f32.mrb[7].mxu0  ;;  %v1030_v48 = vpop.f32.mrb[7].mxu1 }
 0x157   : > { %1181 = vst.msk [vmem:[%s2116_s7 + $0x38] sm:$0xff] %vm1174_vm0, %v870_v47  ;;  %1245 = vst.msk [vmem:[%s2116_s7 + $0x238] sm:$0xff] %vm1174_vm0, %v1030_v48 }
 0x15b   : > { %v874_v49 = vpop.f32.mrb[8].mxu0  ;;  %v1034_v50 = vpop.f32.mrb[8].mxu1 }
 0x15c   : > { %1182 = vst [vmem:[%s2116_s7 + $0x40] sm:$0xff] %v874_v49  ;;  %1246 = vst [vmem:[%s2116_s7 + $0x240] sm:$0xff] %v1034_v50  ;;  %v876_v51 = vpop.f32.mrb[9].mxu0  ;;  %v1036_v52 = vpop.f32.mrb[9].mxu1 }
 0x15d   : > { %1183 = vst.msk [vmem:[%s2116_s7 + $0x48] sm:$0xff] %vm1174_vm0, %v876_v51  ;;  %1247 = vst.msk [vmem:[%s2116_s7 + $0x248] sm:$0xff] %vm1174_vm0, %v1036_v52  ;;  %v878_v53 = vpop.f32.mrb[10].mxu0  ;;  %v1038_v54 = vpop.f32.mrb[10].mxu1 }
 0x15e   : > { %1184 = vst [vmem:[%s2116_s7 + $0x50] sm:$0xff] %v878_v53  ;;  %1248 = vst [vmem:[%s2116_s7 + $0x250] sm:$0xff] %v1038_v54  ;;  %v880_v55 = vpop.f32.mrb[11].mxu0  ;;  %v1040_v56 = vpop.f32.mrb[11].mxu1 }
 0x15f   : > { %1185 = vst.msk [vmem:[%s2116_s7 + $0x58] sm:$0xff] %vm1174_vm0, %v880_v55  ;;  %1249 = vst.msk [vmem:[%s2116_s7 + $0x258] sm:$0xff] %vm1174_vm0, %v1040_v56 }
 0x163   : > { %v884_v57 = vpop.f32.mrb[12].mxu0  ;;  %v1044_v58 = vpop.f32.mrb[12].mxu1 }
 0x164   : > { %1186 = vst [vmem:[%s2116_s7 + $0x60] sm:$0xff] %v884_v57  ;;  %1250 = vst [vmem:[%s2116_s7 + $0x260] sm:$0xff] %v1044_v58  ;;  %v886_v59 = vpop.f32.mrb[13].mxu0  ;;  %v1046_v60 = vpop.f32.mrb[13].mxu1 }
 0x165   : > { %1187 = vst.msk [vmem:[%s2116_s7 + $0x68] sm:$0xff] %vm1174_vm0, %v886_v59  ;;  %1251 = vst.msk [vmem:[%s2116_s7 + $0x268] sm:$0xff] %vm1174_vm0, %v1046_v60  ;;  %v888_v61 = vpop.f32.mrb[14].mxu0  ;;  %v1048_v62 = vpop.f32.mrb[14].mxu1 }
 0x166   : > { %1188 = vst [vmem:[%s2116_s7 + $0x70] sm:$0xff] %v888_v61  ;;  %1252 = vst [vmem:[%s2116_s7 + $0x270] sm:$0xff] %v1048_v62  ;;  %v890_v63 = vpop.f32.mrb[15].mxu0  ;;  %v1050_v0 = vpop.f32.mrb[15].mxu1 }
 0x167   : > { %1189 = vst.msk [vmem:[%s2116_s7 + $0x78] sm:$0xff] %vm1174_vm0, %v890_v63  ;;  %1253 = vst.msk [vmem:[%s2116_s7 + $0x278] sm:$0xff] %vm1174_vm0, %v1050_v0 }
 0x16b   : > { %v894_v1 = vpop.f32.mrb[16].mxu0  ;;  %v1054_v2 = vpop.f32.mrb[16].mxu1 }
 0x16c   : > { %1190 = vst [vmem:[%s2116_s7 + $0x80] sm:$0xff] %v894_v1  ;;  %1254 = vst [vmem:[%s2116_s7 + $0x280] sm:$0xff] %v1054_v2  ;;  %v896_v4 = vpop.f32.mrb[17].mxu0  ;;  %v1056_v5 = vpop.f32.mrb[17].mxu1 }
 0x16d   : > { %1191 = vst.msk [vmem:[%s2116_s7 + $0x88] sm:$0xff] %vm1174_vm0, %v896_v4  ;;  %1255 = vst.msk [vmem:[%s2116_s7 + $0x288] sm:$0xff] %vm1174_vm0, %v1056_v5  ;;  %v898_v6 = vpop.f32.mrb[18].mxu0  ;;  %v1058_v7 = vpop.f32.mrb[18].mxu1 }
 0x16e   : > { %1192 = vst [vmem:[%s2116_s7 + $0x90] sm:$0xff] %v898_v6  ;;  %1256 = vst [vmem:[%s2116_s7 + $0x290] sm:$0xff] %v1058_v7  ;;  %v900_v8 = vpop.f32.mrb[19].mxu0  ;;  %v1060_v9 = vpop.f32.mrb[19].mxu1 }
 0x16f   : > { %1193 = vst.msk [vmem:[%s2116_s7 + $0x98] sm:$0xff] %vm1174_vm0, %v900_v8  ;;  %1257 = vst.msk [vmem:[%s2116_s7 + $0x298] sm:$0xff] %vm1174_vm0, %v1060_v9 }
 0x173   : > { %v904_v10 = vpop.f32.mrb[20].mxu0  ;;  %v1064_v11 = vpop.f32.mrb[20].mxu1 }
 0x174   : > { %1194 = vst [vmem:[%s2116_s7 + $0xa0] sm:$0xff] %v904_v10  ;;  %1258 = vst [vmem:[%s2116_s7 + $0x2a0] sm:$0xff] %v1064_v11  ;;  %v906_v12 = vpop.f32.mrb[21].mxu0  ;;  %v1066_v13 = vpop.f32.mrb[21].mxu1 }
 0x175   : > { %1195 = vst.msk [vmem:[%s2116_s7 + $0xa8] sm:$0xff] %vm1174_vm0, %v906_v12  ;;  %1259 = vst.msk [vmem:[%s2116_s7 + $0x2a8] sm:$0xff] %vm1174_vm0, %v1066_v13  ;;  %v908_v14 = vpop.f32.mrb[22].mxu0  ;;  %v1068_v15 = vpop.f32.mrb[22].mxu1 }
 0x176   : > { %1196 = vst [vmem:[%s2116_s7 + $0xb0] sm:$0xff] %v908_v14  ;;  %1260 = vst [vmem:[%s2116_s7 + $0x2b0] sm:$0xff] %v1068_v15  ;;  %v910_v16 = vpop.f32.mrb[23].mxu0  ;;  %v1070_v17 = vpop.f32.mrb[23].mxu1 }
 0x177   : > { %1197 = vst.msk [vmem:[%s2116_s7 + $0xb8] sm:$0xff] %vm1174_vm0, %v910_v16  ;;  %1261 = vst.msk [vmem:[%s2116_s7 + $0x2b8] sm:$0xff] %vm1174_vm0, %v1070_v17 }
 0x17b   : > { %v914_v18 = vpop.f32.mrb[24].mxu0  ;;  %v1074_v19 = vpop.f32.mrb[24].mxu1 }
 0x17c   : > { %1198 = vst [vmem:[%s2116_s7 + $0xc0] sm:$0xff] %v914_v18  ;;  %1262 = vst [vmem:[%s2116_s7 + $0x2c0] sm:$0xff] %v1074_v19  ;;  %v916_v20 = vpop.f32.mrb[25].mxu0  ;;  %v1076_v21 = vpop.f32.mrb[25].mxu1 }
 0x17d   : > { %1199 = vst.msk [vmem:[%s2116_s7 + $0xc8] sm:$0xff] %vm1174_vm0, %v916_v20  ;;  %1263 = vst.msk [vmem:[%s2116_s7 + $0x2c8] sm:$0xff] %vm1174_vm0, %v1076_v21  ;;  %v918_v22 = vpop.f32.mrb[26].mxu0  ;;  %v1078_v23 = vpop.f32.mrb[26].mxu1 }
 0x17e   : > { %1200 = vst [vmem:[%s2116_s7 + $0xd0] sm:$0xff] %v918_v22  ;;  %1264 = vst [vmem:[%s2116_s7 + $0x2d0] sm:$0xff] %v1078_v23  ;;  %v920_v24 = vpop.f32.mrb[27].mxu0  ;;  %v1080_v25 = vpop.f32.mrb[27].mxu1 }
 0x17f   : > { %1201 = vst.msk [vmem:[%s2116_s7 + $0xd8] sm:$0xff] %vm1174_vm0, %v920_v24  ;;  %1265 = vst.msk [vmem:[%s2116_s7 + $0x2d8] sm:$0xff] %vm1174_vm0, %v1080_v25 }
 0x183   : > { %v924_v26 = vpop.f32.mrb[28].mxu0  ;;  %v1084_v27 = vpop.f32.mrb[28].mxu1 }
 0x184   : > { %1202 = vst [vmem:[%s2116_s7 + $0xe0] sm:$0xff] %v924_v26  ;;  %1266 = vst [vmem:[%s2116_s7 + $0x2e0] sm:$0xff] %v1084_v27  ;;  %v926_v28 = vpop.f32.mrb[29].mxu0  ;;  %v1086_v29 = vpop.f32.mrb[29].mxu1 }
 0x185   : > { %1203 = vst.msk [vmem:[%s2116_s7 + $0xe8] sm:$0xff] %vm1174_vm0, %v926_v28  ;;  %1267 = vst.msk [vmem:[%s2116_s7 + $0x2e8] sm:$0xff] %vm1174_vm0, %v1086_v29  ;;  %v928_v30 = vpop.f32.mrb[30].mxu0  ;;  %v1088_v31 = vpop.f32.mrb[30].mxu1 }
 0x186   : > { %1204 = vst [vmem:[%s2116_s7 + $0xf0] sm:$0xff] %v928_v30  ;;  %1268 = vst [vmem:[%s2116_s7 + $0x2f0] sm:$0xff] %v1088_v31  ;;  %v930_v32 = vpop.f32.mrb[31].mxu0  ;;  %v1090_v33 = vpop.f32.mrb[31].mxu1 }
 0x187   : > { %1205 = vst.msk [vmem:[%s2116_s7 + $0xf8] sm:$0xff] %vm1174_vm0, %v930_v32  ;;  %1269 = vst.msk [vmem:[%s2116_s7 + $0x2f8] sm:$0xff] %vm1174_vm0, %v1090_v33 }
 0x18b   : > { %v934_v34 = vpop.f32.mrb[32].mxu0  ;;  %v1094_v35 = vpop.f32.mrb[32].mxu1 }
 0x18c   : > { %1206 = vst [vmem:[%s2116_s7 + $0x100] sm:$0xff] %v934_v34  ;;  %1270 = vst [vmem:[%s2116_s7 + $0x300] sm:$0xff] %v1094_v35  ;;  %v936_v36 = vpop.f32.mrb[33].mxu0  ;;  %v1096_v37 = vpop.f32.mrb[33].mxu1 }
 0x18d   : > { %1207 = vst.msk [vmem:[%s2116_s7 + $0x108] sm:$0xff] %vm1174_vm0, %v936_v36  ;;  %1271 = vst.msk [vmem:[%s2116_s7 + $0x308] sm:$0xff] %vm1174_vm0, %v1096_v37  ;;  %v938_v3 = vpop.f32.mrb[34].mxu0  ;;  %v1098_v38 = vpop.f32.mrb[34].mxu1 }
 0x18e   : > { %1208 = vst [vmem:[%s2116_s7 + $0x110] sm:$0xff] %v938_v3  ;;  %1272 = vst [vmem:[%s2116_s7 + $0x310] sm:$0xff] %v1098_v38  ;;  %v940_v39 = vpop.f32.mrb[35].mxu0  ;;  %v1100_v40 = vpop.f32.mrb[35].mxu1 }
 0x18f   : > { %1209 = vst.msk [vmem:[%s2116_s7 + $0x118] sm:$0xff] %vm1174_vm0, %v940_v39  ;;  %1273 = vst.msk [vmem:[%s2116_s7 + $0x318] sm:$0xff] %vm1174_vm0, %v1100_v40 }
 0x193   : > { %v944_v41 = vpop.f32.mrb[36].mxu0  ;;  %v1104_v42 = vpop.f32.mrb[36].mxu1 }
 0x194   : > { %1210 = vst [vmem:[%s2116_s7 + $0x120] sm:$0xff] %v944_v41  ;;  %1274 = vst [vmem:[%s2116_s7 + $0x320] sm:$0xff] %v1104_v42  ;;  %v946_v43 = vpop.f32.mrb[37].mxu0  ;;  %v1106_v44 = vpop.f32.mrb[37].mxu1 }
 0x195   : > { %1211 = vst.msk [vmem:[%s2116_s7 + $0x128] sm:$0xff] %vm1174_vm0, %v946_v43  ;;  %1275 = vst.msk [vmem:[%s2116_s7 + $0x328] sm:$0xff] %vm1174_vm0, %v1106_v44  ;;  %v948_v45 = vpop.f32.mrb[38].mxu0  ;;  %v1108_v46 = vpop.f32.mrb[38].mxu1 }
 0x196   : > { %1212 = vst [vmem:[%s2116_s7 + $0x130] sm:$0xff] %v948_v45  ;;  %1276 = vst [vmem:[%s2116_s7 + $0x330] sm:$0xff] %v1108_v46  ;;  %v950_v47 = vpop.f32.mrb[39].mxu0  ;;  %v1110_v48 = vpop.f32.mrb[39].mxu1 }
 0x197   : > { %1213 = vst.msk [vmem:[%s2116_s7 + $0x138] sm:$0xff] %vm1174_vm0, %v950_v47  ;;  %1277 = vst.msk [vmem:[%s2116_s7 + $0x338] sm:$0xff] %vm1174_vm0, %v1110_v48 }
 0x19b   : > { %v954_v49 = vpop.f32.mrb[40].mxu0  ;;  %v1114_v50 = vpop.f32.mrb[40].mxu1 }
 0x19c   : > { %1214 = vst [vmem:[%s2116_s7 + $0x140] sm:$0xff] %v954_v49  ;;  %1278 = vst [vmem:[%s2116_s7 + $0x340] sm:$0xff] %v1114_v50  ;;  %v956_v51 = vpop.f32.mrb[41].mxu0  ;;  %v1116_v52 = vpop.f32.mrb[41].mxu1 }
 0x19d   : > { %1215 = vst.msk [vmem:[%s2116_s7 + $0x148] sm:$0xff] %vm1174_vm0, %v956_v51  ;;  %1279 = vst.msk [vmem:[%s2116_s7 + $0x348] sm:$0xff] %vm1174_vm0, %v1116_v52  ;;  %v958_v53 = vpop.f32.mrb[42].mxu0  ;;  %v1118_v54 = vpop.f32.mrb[42].mxu1 }
 0x19e   : > { %1216 = vst [vmem:[%s2116_s7 + $0x150] sm:$0xff] %v958_v53  ;;  %1280 = vst [vmem:[%s2116_s7 + $0x350] sm:$0xff] %v1118_v54  ;;  %v960_v55 = vpop.f32.mrb[43].mxu0  ;;  %v1120_v56 = vpop.f32.mrb[43].mxu1 }
 0x19f   : > { %1217 = vst.msk [vmem:[%s2116_s7 + $0x158] sm:$0xff] %vm1174_vm0, %v960_v55  ;;  %1281 = vst.msk [vmem:[%s2116_s7 + $0x358] sm:$0xff] %vm1174_vm0, %v1120_v56 }
 0x1a3   : > { %v964_v57 = vpop.f32.mrb[44].mxu0  ;;  %v1124_v58 = vpop.f32.mrb[44].mxu1 }
 0x1a4   : > { %1218 = vst [vmem:[%s2116_s7 + $0x160] sm:$0xff] %v964_v57  ;;  %1282 = vst [vmem:[%s2116_s7 + $0x360] sm:$0xff] %v1124_v58  ;;  %v966_v59 = vpop.f32.mrb[45].mxu0  ;;  %v1126_v60 = vpop.f32.mrb[45].mxu1 }
 0x1a5   : > { %1219 = vst.msk [vmem:[%s2116_s7 + $0x168] sm:$0xff] %vm1174_vm0, %v966_v59  ;;  %1283 = vst.msk [vmem:[%s2116_s7 + $0x368] sm:$0xff] %vm1174_vm0, %v1126_v60  ;;  %v968_v61 = vpop.f32.mrb[46].mxu0  ;;  %v1128_v62 = vpop.f32.mrb[46].mxu1 }
 0x1a6   : > { %1220 = vst [vmem:[%s2116_s7 + $0x170] sm:$0xff] %v968_v61  ;;  %1284 = vst [vmem:[%s2116_s7 + $0x370] sm:$0xff] %v1128_v62  ;;  %v970_v63 = vpop.f32.mrb[47].mxu0  ;;  %v1130_v0 = vpop.f32.mrb[47].mxu1 }
 0x1a7   : > { %1221 = vst.msk [vmem:[%s2116_s7 + $0x178] sm:$0xff] %vm1174_vm0, %v970_v63  ;;  %1285 = vst.msk [vmem:[%s2116_s7 + $0x378] sm:$0xff] %vm1174_vm0, %v1130_v0 }
 0x1ab   : > { %v974_v1 = vpop.f32.mrb[48].mxu0  ;;  %v1134_v2 = vpop.f32.mrb[48].mxu1 }
 0x1ac   : > { %1222 = vst [vmem:[%s2116_s7 + $0x180] sm:$0xff] %v974_v1  ;;  %1286 = vst [vmem:[%s2116_s7 + $0x380] sm:$0xff] %v1134_v2  ;;  %v976_v4 = vpop.f32.mrb[49].mxu0  ;;  %v1136_v5 = vpop.f32.mrb[49].mxu1 }
 0x1ad   : > { %1223 = vst.msk [vmem:[%s2116_s7 + $0x188] sm:$0xff] %vm1174_vm0, %v976_v4  ;;  %1287 = vst.msk [vmem:[%s2116_s7 + $0x388] sm:$0xff] %vm1174_vm0, %v1136_v5  ;;  %v978_v6 = vpop.f32.mrb[50].mxu0  ;;  %v1138_v7 = vpop.f32.mrb[50].mxu1 }
 0x1ae   : > { %1224 = vst [vmem:[%s2116_s7 + $0x190] sm:$0xff] %v978_v6  ;;  %1288 = vst [vmem:[%s2116_s7 + $0x390] sm:$0xff] %v1138_v7  ;;  %v980_v8 = vpop.f32.mrb[51].mxu0  ;;  %v1140_v9 = vpop.f32.mrb[51].mxu1 }
 0x1af   : > { %1225 = vst.msk [vmem:[%s2116_s7 + $0x198] sm:$0xff] %vm1174_vm0, %v980_v8  ;;  %1289 = vst.msk [vmem:[%s2116_s7 + $0x398] sm:$0xff] %vm1174_vm0, %v1140_v9 }
 0x1b3   : > { %v984_v10 = vpop.f32.mrb[52].mxu0  ;;  %v1144_v11 = vpop.f32.mrb[52].mxu1 }
 0x1b4   : > { %1226 = vst [vmem:[%s2116_s7 + $0x1a0] sm:$0xff] %v984_v10  ;;  %1290 = vst [vmem:[%s2116_s7 + $0x3a0] sm:$0xff] %v1144_v11  ;;  %v986_v12 = vpop.f32.mrb[53].mxu0  ;;  %v1146_v13 = vpop.f32.mrb[53].mxu1 }
 0x1b5   : > { %1227 = vst.msk [vmem:[%s2116_s7 + $0x1a8] sm:$0xff] %vm1174_vm0, %v986_v12  ;;  %1291 = vst.msk [vmem:[%s2116_s7 + $0x3a8] sm:$0xff] %vm1174_vm0, %v1146_v13  ;;  %v988_v14 = vpop.f32.mrb[54].mxu0  ;;  %v1148_v15 = vpop.f32.mrb[54].mxu1 }
 0x1b6   : > { %1228 = vst [vmem:[%s2116_s7 + $0x1b0] sm:$0xff] %v988_v14  ;;  %1292 = vst [vmem:[%s2116_s7 + $0x3b0] sm:$0xff] %v1148_v15  ;;  %v990_v16 = vpop.f32.mrb[55].mxu0  ;;  %v1150_v17 = vpop.f32.mrb[55].mxu1 }
 0x1b7   : > { %1229 = vst.msk [vmem:[%s2116_s7 + $0x1b8] sm:$0xff] %vm1174_vm0, %v990_v16  ;;  %1293 = vst.msk [vmem:[%s2116_s7 + $0x3b8] sm:$0xff] %vm1174_vm0, %v1150_v17 }
 0x1bb   : > { %v994_v18 = vpop.f32.mrb[56].mxu0  ;;  %v1154_v19 = vpop.f32.mrb[56].mxu1 }
 0x1bc   : > { %1230 = vst [vmem:[%s2116_s7 + $0x1c0] sm:$0xff] %v994_v18  ;;  %1294 = vst [vmem:[%s2116_s7 + $0x3c0] sm:$0xff] %v1154_v19  ;;  %v996_v20 = vpop.f32.mrb[57].mxu0  ;;  %v1156_v21 = vpop.f32.mrb[57].mxu1 }
 0x1bd   : > { %1231 = vst.msk [vmem:[%s2116_s7 + $0x1c8] sm:$0xff] %vm1174_vm0, %v996_v20  ;;  %1295 = vst.msk [vmem:[%s2116_s7 + $0x3c8] sm:$0xff] %vm1174_vm0, %v1156_v21  ;;  %v998_v22 = vpop.f32.mrb[58].mxu0  ;;  %v1158_v23 = vpop.f32.mrb[58].mxu1 }
 0x1be   : > { %1232 = vst [vmem:[%s2116_s7 + $0x1d0] sm:$0xff] %v998_v22  ;;  %1296 = vst [vmem:[%s2116_s7 + $0x3d0] sm:$0xff] %v1158_v23  ;;  %v1000_v24 = vpop.f32.mrb[59].mxu0  ;;  %v1160_v25 = vpop.f32.mrb[59].mxu1 }
 0x1bf   : > { %1233 = vst.msk [vmem:[%s2116_s7 + $0x1d8] sm:$0xff] %vm1174_vm0, %v1000_v24  ;;  %1297 = vst.msk [vmem:[%s2116_s7 + $0x3d8] sm:$0xff] %vm1174_vm0, %v1160_v25 }
 0x1c3   : > { %v1004_v26 = vpop.f32.mrb[60].mxu0  ;;  %v1164_v27 = vpop.f32.mrb[60].mxu1 }
 0x1c4   : > { %1234 = vst [vmem:[%s2116_s7 + $0x1e0] sm:$0xff] %v1004_v26  ;;  %1298 = vst [vmem:[%s2116_s7 + $0x3e0] sm:$0xff] %v1164_v27  ;;  %v1006_v28 = vpop.f32.mrb[61].mxu0  ;;  %v1166_v29 = vpop.f32.mrb[61].mxu1 }
 0x1c5   : > { %1235 = vst.msk [vmem:[%s2116_s7 + $0x1e8] sm:$0xff] %vm1174_vm0, %v1006_v28  ;;  %1299 = vst.msk [vmem:[%s2116_s7 + $0x3e8] sm:$0xff] %vm1174_vm0, %v1166_v29  ;;  %v1008_v30 = vpop.f32.mrb[62].mxu0  ;;  %v1168_v31 = vpop.f32.mrb[62].mxu1 }
 0x1c6   : > { %1236 = vst [vmem:[%s2116_s7 + $0x1f0] sm:$0xff] %v1008_v30  ;;  %1300 = vst [vmem:[%s2116_s7 + $0x3f0] sm:$0xff] %v1168_v31  ;;  %v1010_v32 = vpop.f32.mrb[63].mxu0  ;;  %v1170_v33 = vpop.f32.mrb[63].mxu1 }
 0x1c7   : > { %1237 = vst.msk [vmem:[%s2116_s7 + $0x1f8] sm:$0xff] %vm1174_vm0, %v1010_v32  ;;  %1301 = vst.msk [vmem:[%s2116_s7 + $0x3f8] sm:$0xff] %vm1174_vm0, %v1170_v33 }
 0x1c8 PF: > { %s15_s14 = sadd.s32 1, %s1796_s14   ;;  %s2334_s9 = smov %s1780_s10 }
 0x1c9   : > { %p12_p9 = scmp.ge.s32.totalorder %s15_s14, 4   ;;  %s2335_s10 = smov %s1784_s11 }
 0x1ca   : > { %s2336_s11 = smov %s1866_s21  ;;  %s2337_s12 = smov %s1792_s13 }
 0x1cb   : > { %s2338_s13 = smov %s2340_s16  ;;  %14 = sbr.rel (!%p12_p9) target bundleno = 4 (0x4), region = 71 }
 0x1d2   :  { %1334 = vsyncpa [#allocation3], 1 }
 0x1d3   :  { %1336 = vsyncpa [#allocation3 + $0x1], 1 }

</bundles_post_ra>
